<compile_context>
chip_gen: v7x
topology: tpu7x:2x2x1
jax: 0.10.0
libtpu: 0.0.40
codegen_flags: <defaults>
</compile_context>

<pallas_src>
import functools
import math

import jax
import jax.numpy as jnp
from jax.experimental import pallas as pl
from jax.experimental.pallas import tpu as pltpu


def _sh_attention_kernel(x_ref, wqkv_ref, z_ref, attn_ref, *, bb, S, D):
    """One grid step processes `bb` batch elements.

    x_ref:    (bb*S, D)  f32   batch-folded input slab
    wqkv_ref: (D, 3*D)   bf16  fused [Wq | Wk | Wv] in (in, out) layout
    z_ref:    (bb, S, D) f32   attention output
    attn_ref: (bb, S, S) f32   softmax-normalized attention weights
    """
    # ---- fused Q/K/V projection: one wide MXU matmul (N = 3D), f32 accumulate ----
    x = x_ref[...].astype(jnp.bfloat16)
    qkv = jnp.dot(x, wqkv_ref[...], preferred_element_type=jnp.float32)   # (bb*S, 3D)

    q = qkv[:, 0:D].reshape(bb, S, D)
    k = qkv[:, D:2 * D].reshape(bb, S, D)
    v = qkv[:, 2 * D:3 * D].reshape(bb, S, D)

    # ---- scores: (q / D^0.25) @ (k / D^0.25)^T  ==  (q @ k^T) * (1/sqrt(D)) ----
    s = jnp.einsum("bqd,bkd->bqk",
                   q.astype(jnp.bfloat16), k.astype(jnp.bfloat16),
                   preferred_element_type=jnp.float32)                    # (bb, S, S)
    s = s * (1.0 / float(D) ** 0.5)

    # ---- softmax over the key axis (dim=2) in f32; approx reciprocal -> EUP ----
    m = jnp.max(s, axis=-1, keepdims=True)
    e = jnp.exp(s - m)
    p = e * pl.reciprocal(jnp.sum(e, axis=-1, keepdims=True), approx=True)
    attn_ref[...] = p.astype(attn_ref.dtype)

    # ---- z = attn @ v ----
    z = jnp.einsum("bqk,bkd->bqd",
                   p.astype(jnp.bfloat16), v.astype(jnp.bfloat16),
                   preferred_element_type=jnp.float32)                    # (bb, S, D)
    z_ref[...] = z.astype(z_ref.dtype)


def sh_self_attention(x, wq, wk, wv, *, batch_block=None):
    """x: (B, S, D) f32.  wq/wk/wv: (D, D) in (in, out) layout (== PyTorch weight.T).

    batch_block: batch elements per grid step.  Default = B (whole batch in one
    step -> best on v5e/v6e).  On v7x use B // 2 so the two TensorCores each
    take half of the batch (the grid axis is marked "parallel").
    """
    B, S, D = x.shape
    bb = B if batch_block is None else batch_block
    assert B % bb == 0, "batch_block must divide the batch"

    x_flat = x.reshape(B * S, D)                                          # fold batch
    wqkv = jnp.concatenate([wq, wk, wv], axis=1).astype(jnp.bfloat16)     # (D, 3D) bf16

    kernel = functools.partial(_sh_attention_kernel, bb=bb, S=S, D=D)
    z, attn = pl.pallas_call(
        kernel,
        out_shape=(jax.ShapeDtypeStruct((B, S, D), x.dtype),
                   jax.ShapeDtypeStruct((B, S, S), jnp.float32)),
        grid_spec=pltpu.PrefetchScalarGridSpec(
            num_scalar_prefetch=0,
            grid=(B // bb,),
            in_specs=[
                pl.BlockSpec((bb * S, D), lambda i: (i, 0)),   # batch-folded x
                pl.BlockSpec((D, 3 * D), lambda i: (0, 0)),    # fused Wqkv (resident)
            ],
            out_specs=(
                pl.BlockSpec((bb, S, D), lambda i: (i, 0, 0)),  # z
                pl.BlockSpec((bb, S, S), lambda i: (i, 0, 0)),  # attention weights
            ),
        ),
        compiler_params=pltpu.CompilerParams(
            dimension_semantics=("parallel",)),                 # batch chunks independent
    )(x_flat, wqkv)
    return z, attn


def reference(x, wq, wk, wv):
    """Pure-JAX f32 reference mirroring the PyTorch forward exactly."""
    D = x.shape[-1]
    scale = 1.0 / float(D) ** 0.25
    q = (x @ wq) * scale
    k = (x @ wk) * scale
    v = x @ wv
    attn = jax.nn.softmax(jnp.einsum("bqd,bkd->bqk", q, k), axis=-1)
    z = jnp.einsum("bqk,bkd->bqd", attn, v)
    return z, attn


if __name__ == "__main__":
    B, S, D = 2, 8, 32   # (batch, "deepadr similarity type vector", input_size)
    key = jax.random.PRNGKey(0)
    kx, kq, kk, kv = jax.random.split(key, 4)
    x = jax.random.normal(kx, (B, S, D), jnp.float32)

    bound = 1.0 / math.sqrt(D)   # nn.Linear default init, stored as (in, out) = W.T
    wq = jax.random.uniform(kq, (D, D), jnp.float32, -bound, bound)
    wk = jax.random.uniform(kk, (D, D), jnp.float32, -bound, bound)
    wv = jax.random.uniform(kv, (D, D), jnp.float32, -bound, bound)

    z, attn = sh_self_attention(x, wq, wk, wv)
    z, attn = jax.block_until_ready((z, attn))

    z_ref, attn_ref = reference(x, wq, wk, wv)
    assert z.shape == (B, S, D) and attn.shape == (B, S, S)
    # Kernel uses bf16 MXU operands with f32 accumulation; compare vs f32 reference.
    assert jnp.allclose(z, z_ref, rtol=2e-2, atol=2e-2), "z mismatch vs reference"
    assert jnp.allclose(attn, attn_ref, rtol=2e-2, atol=2e-2), "attn mismatch vs reference"
    print("KERNEL_OK")
</pallas_src>

<mosaic_0001>
module attributes {stable_mosaic.version = 11 : i64} {
  func.func @_sh_attention_kernel(%arg0: i32, %arg1: memref<16x32xf32, #tpu.memory_space<vmem>>, %arg2: memref<32x96xbf16, #tpu.memory_space<vmem>>, %arg3: memref<2x8x32xf32, #tpu.memory_space<vmem>>, %arg4: memref<2x8x8xf32, #tpu.memory_space<vmem>>) attributes {dimension_semantics = [#tpu.dimension_semantics<parallel>], iteration_bounds = array<i64: 1>, scalar_prefetch = 0 : i64, scratch_operands = 0 : i64, tpu.core_type = #tpu.core_type<tc>, window_params = [{transform_indices = @transform_0, window_bounds = array<i64: 16, 32>}, {pipeline_mode = #tpu.pipeline_mode<synchronous>, transform_indices = @transform_1, window_bounds = array<i64: 32, 96>}, {transform_indices = @transform_2, window_bounds = array<i64: 2, 8, 32>}, {transform_indices = @transform_3, window_bounds = array<i64: 2, 8, 8>}]} {
    %c0 = arith.constant 0 : index
    %c0_0 = arith.constant 0 : index
    %0 = vector.load %arg1[%c0, %c0_0] : memref<16x32xf32, #tpu.memory_space<vmem>>, vector<16x32xf32>
    %1 = arith.truncf %0 : vector<16x32xf32> to vector<16x32xbf16>
    %c0_1 = arith.constant 0 : index
    %c0_2 = arith.constant 0 : index
    %2 = vector.load %arg2[%c0_1, %c0_2] : memref<32x96xbf16, #tpu.memory_space<vmem>>, vector<32x96xbf16>
    %cst = arith.constant dense<0.000000e+00> : vector<16x96xf32>
    %3 = tpu.matmul %1, %2, %cst {dimension_numbers = #tpu.dot_dimension_numbers<[1], [0], [0], [1], [0, 0, 1, 1], [], []>} : vector<16x32xbf16>, vector<32x96xbf16>, vector<16x96xf32> -> vector<16x96xf32>
    %4 = vector.extract_strided_slice %3 {offsets = [0, 0], sizes = [16, 32], strides = [1, 1]} : vector<16x96xf32> to vector<16x32xf32>
    %5 = vector.shape_cast %4 : vector<16x32xf32> to vector<2x8x32xf32>
    %6 = vector.extract_strided_slice %3 {offsets = [0, 32], sizes = [16, 32], strides = [1, 1]} : vector<16x96xf32> to vector<16x32xf32>
    %7 = vector.shape_cast %6 : vector<16x32xf32> to vector<2x8x32xf32>
    %8 = vector.extract_strided_slice %3 {offsets = [0, 64], sizes = [16, 32], strides = [1, 1]} : vector<16x96xf32> to vector<16x32xf32>
    %9 = vector.shape_cast %8 : vector<16x32xf32> to vector<2x8x32xf32>
    %10 = arith.truncf %5 : vector<2x8x32xf32> to vector<2x8x32xbf16>
    %11 = arith.truncf %7 : vector<2x8x32xf32> to vector<2x8x32xbf16>
    "tpu.trace_start"() <{level = 10 : i32, message = "bqd,bkd->bqk"}> : () -> ()
    %cst_3 = arith.constant dense<0.000000e+00> : vector<2x8x8xf32>
    %12 = tpu.matmul %10, %11, %cst_3 {dimension_numbers = #tpu.dot_dimension_numbers<[2], [2], [1], [1], [0, 0, 0, 1, 1, 1], [0], [0]>} : vector<2x8x32xbf16>, vector<2x8x32xbf16>, vector<2x8x8xf32> -> vector<2x8x8xf32>
    "tpu.trace_stop"() : () -> ()
    %cst_4 = arith.constant 0.176776692 : f32
    %13 = vector.broadcast %cst_4 : f32 to vector<2x8x8xf32>
    %14 = arith.mulf %12, %13 : vector<2x8x8xf32>
    %cst_5 = arith.constant dense<0xFF800000> : vector<2x8xf32>
    %15 = vector.multi_reduction <maximumf>, %14, %cst_5 [2] : vector<2x8x8xf32> to vector<2x8xf32>
    %16 = vector.shape_cast %15 : vector<2x8xf32> to vector<2x8x1xf32>
    %17 = vector.broadcast %16 : vector<2x8x1xf32> to vector<2x8x8xf32>
    %18 = arith.subf %14, %17 : vector<2x8x8xf32>
    %19 = math.exp %18 : vector<2x8x8xf32>
    %cst_6 = arith.constant dense<0.000000e+00> : vector<2x8xf32>
    %20 = vector.multi_reduction <add>, %19, %cst_6 [2] : vector<2x8x8xf32> to vector<2x8xf32>
    %21 = vector.shape_cast %20 : vector<2x8xf32> to vector<2x8x1xf32>
    %22 = tpu.reciprocal %21 {approx = true} : vector<2x8x1xf32> -> vector<2x8x1xf32>
    %23 = vector.broadcast %22 : vector<2x8x1xf32> to vector<2x8x8xf32>
    %24 = arith.mulf %19, %23 : vector<2x8x8xf32>
    %c0_7 = arith.constant 0 : index
    %c0_8 = arith.constant 0 : index
    %c0_9 = arith.constant 0 : index
    %25 = vector.load %arg4[%c0_7, %c0_8, %c0_9] : memref<2x8x8xf32, #tpu.memory_space<vmem>>, vector<2x8x8xf32>
    tpu.vector_store %arg4[%c0_7, %c0_8, %c0_9], %24 {strides = array<i32>} : memref<2x8x8xf32, #tpu.memory_space<vmem>>, vector<2x8x8xf32>,
    %26 = arith.truncf %24 : vector<2x8x8xf32> to vector<2x8x8xbf16>
    %27 = arith.truncf %9 : vector<2x8x32xf32> to vector<2x8x32xbf16>
    "tpu.trace_start"() <{level = 10 : i32, message = "bqk,bkd->bqd"}> : () -> ()
    %cst_10 = arith.constant dense<0.000000e+00> : vector<2x8x32xf32>
    %28 = tpu.matmul %26, %27, %cst_10 {dimension_numbers = #tpu.dot_dimension_numbers<[2], [1], [1], [2], [0, 0, 0, 1, 1, 2], [0], [0]>} : vector<2x8x8xbf16>, vector<2x8x32xbf16>, vector<2x8x32xf32> -> vector<2x8x32xf32>
    "tpu.trace_stop"() : () -> ()
    %c0_11 = arith.constant 0 : index
    %c0_12 = arith.constant 0 : index
    %c0_13 = arith.constant 0 : index
    %29 = vector.load %arg3[%c0_11, %c0_12, %c0_13] : memref<2x8x32xf32, #tpu.memory_space<vmem>>, vector<2x8x32xf32>
    tpu.vector_store %arg3[%c0_11, %c0_12, %c0_13], %28 {strides = array<i32>} : memref<2x8x32xf32, #tpu.memory_space<vmem>>, vector<2x8x32xf32>,
    return
  }
  func.func @transform_0(%arg0: i32) -> (i32, i32) {
    %c0_i32 = arith.constant 0 : i32
    %c0_i32_0 = arith.constant 0 : i32
    return %arg0, %c0_i32 : i32, i32
  }
  func.func @transform_1(%arg0: i32) -> (i32, i32) {
    %c0_i32 = arith.constant 0 : i32
    %c0_i32_0 = arith.constant 0 : i32
    %c0_i32_1 = arith.constant 0 : i32
    return %c0_i32, %c0_i32_0 : i32, i32
  }
  func.func @transform_2(%arg0: i32) -> (i32, i32, i32) {
    %c0_i32 = arith.constant 0 : i32
    %c0_i32_0 = arith.constant 0 : i32
    %c0_i32_1 = arith.constant 0 : i32
    return %arg0, %c0_i32, %c0_i32_0 : i32, i32, i32
  }
  func.func @transform_3(%arg0: i32) -> (i32, i32, i32) {
    %c0_i32 = arith.constant 0 : i32
    %c0_i32_0 = arith.constant 0 : i32
    %c0_i32_1 = arith.constant 0 : i32
    return %arg0, %c0_i32, %c0_i32_0 : i32, i32, i32
  }
}

</mosaic_0001>

<bundles_post_ra>
// kernel: tpu_custom_call.1
= control target key start
LH: loop header
LB: loop body
LE: loop exit
PB: predicated region body
PF: predicated region fallthrough
CT: control target
= control target key end

     0   :  { %9 = vsyncpa [#allocation3], 0  ;;  %s651_s0 = inlined_call_operand.hbm [shape: f32[16,32], index: 0, kind: input, shape index: {}]   ;;  %s652_s1 = inlined_call_operand.hbm [shape: bf16[32,96], index: 1, kind: input, shape index: {}]   ;;  %s653_s2 = inlined_call_operand.hbm [shape: f32[2,8,32], index: 2, kind: output, shape index: {0}]   ;;  %s654_s3 = inlined_call_operand.hbm [shape: f32[2,8,8], index: 3, kind: output, shape index: {1}]  }
   0x1   :  { %10 = vsyncpa [#allocation6], 0 }
   0x2   :  { %11 = vsyncpa [#allocation4], 0 }
   0x3   :  { %12 = vsyncpa [#allocation9], 0  ;;  %s537_s12 = smov [#allocation2]   ;;  %s441_s16 = scalar_lea.hbm %s651_s0, 256 }
   0x4   :  { %s18_s13 = sshll.u32 %s537_s12, 4  ;;  %p442_p0 = scmp.ne.s32.totalorder %s651_s0, %s441_s16  ;;  %s19_s13 = int_to_ptr.vmem [resolvable:$true] %s18_s13 }
   0x5   :  { %p445_p1 = scmp.lt.u32.totalorder %s441_s16, %s651_s0 }
   0x7   :  { %p447_p2 = pnand %p445_p1, %p442_p0 }
   0x9   :  { %450 = shalt.err (!%p447_p2)
}
   0xa   :  { %s451_s21 = scalar_lea.vmem %s19_s13, 256  ;;  %p456_p4 = scmp.lt.s32.totalorder %s19_s13, %s19_s13 }
   0xb   :  { %p452_p3 = scmp.ne.s32.totalorder %s19_s13, %s451_s21  ;;  %p457_p5 = scmp.lt.s32.totalorder %s451_s21, %s451_s21 }
   0xd   :  { %p458_p6 = por %p457_p5, %p456_p4 }
   0xf   :  { %p459_p7 = pnand %p458_p6, %p452_p3 }
  0x11   :  { %462 = shalt.err (!%p459_p7)
}
  0x12   :  { %s538_s22 = smov 128   ;;  %s539_s23 = smov 8  }
  0x13   :  { %24 = dma.hbm_to_vmem [thread:$0]  %s651_s0, 256, %s19_s13, [#allocation3], %s538_s22, %s538_s22, %s539_s23  }
  0x14   :  { %s540_s26 = smov [#allocation5]   ;;  %s463_s30 = scalar_lea.hbm %s652_s1, 256 }
  0x15   :  { %s30_s27 = sshll.u32 %s540_s26, 4  ;;  %p464_p8 = scmp.ne.s32.totalorder %s652_s1, %s463_s30  ;;  %s31_s27 = int_to_ptr.vmem [resolvable:$true] %s30_s27 }
  0x16   :  { %p467_p9 = scmp.lt.u32.totalorder %s463_s30, %s652_s1 }
  0x18   :  { %p469_p10 = pnand %p467_p9, %p464_p8 }
  0x1a   :  { %472 = shalt.err (!%p469_p10)
}
  0x1b   :  { %s473_s8 = scalar_lea.vmem %s31_s27, 256  ;;  %p478_p12 = scmp.lt.s32.totalorder %s31_s27, %s31_s27 }
  0x1c   :  { %p474_p11 = scmp.ne.s32.totalorder %s31_s27, %s473_s8  ;;  %p479_p13 = scmp.lt.s32.totalorder %s473_s8, %s473_s8 }
  0x1e   :  { %p480_p0 = por %p479_p13, %p478_p12 }
  0x20   :  { %p481_p1 = pnand %p480_p0, %p474_p11 }
  0x22   :  { %484 = shalt.err (!%p481_p1)
}
  0x23   :  { %s541_s0 = smov 64   ;;  %s542_s9 = smov 4  }
  0x24   :  { %36 = dma.hbm_to_vmem [thread:$0]  %s652_s1, 256, %s31_s27, [#allocation6], %s541_s0, %s541_s0, %s542_s9  }
  0x25   :  { %529 = dma.done.wait [#allocation3], 256  }
  0x26   :  { %530 = vsyncadd [#allocation3], 4294967040 }
  0x27   :  { %531 = dma.done.wait [#allocation6], 256  }
  0x28   :  { %532 = vsyncadd [#allocation6], 4294967040  ;;  %v543_v0 = vmov 0.0   ;;  %vm544_vm0 = vmmov 0   ;;  %v431_v1 = vld [vmem:[#allocation5] sm:$0xff]   ;;  %v432_v2 = vld [vmem:[#allocation5 + $0x8] sm:$0xff]  }
  0x29   :  { %388 = vmatprep.subr.bf16.mxu0 %v543_v0  ;;  %392 = vmatprep.mubr.msk.bf16.mxu0 %vm544_vm0, %v543_v0  ;;  %v44_v3 = vld [vmem:[#allocation2] sm:$0xff]  ;;  %v45_v4 = vld [vmem:[#allocation2 + $0x8] sm:$0xff]  ;;  %vm63_vm1 = vcmask 261120   ;;  %s545_s1 = smov 96   ;;  %vm210_vm2 = vcmask 64512   ;;  %vm242_vm3 = vcmask 1043456  }
  0x2a   :  { %396 = vmatprep.subr.bf16.mxu1 %v543_v0  ;;  %398 = vmatprep.mubr.msk.bf16.mxu1 %vm544_vm0, %v543_v0  ;;  %v46_v5 = vpack.c.bf16 %v45_v4, %v44_v3  ;;  %s546_s12 = smov [#allocation8]  }
  0x2b   :  { %389 = vmatpush3.bf16.msra.mxu0 %v431_v1  ;;  %s353_s13 = sshll.u32 %s546_s12, 4  ;;  %s354_s13 = int_to_ptr.vmem [resolvable:$true] %s353_s13 }
  0x2c   :  { %390 = vmatprep.subr.bf16.mxu0 %v543_v0  ;;  %s485_s14 = scalar_lea.vmem %s354_s13, 256  ;;  %p490_p3 = scmp.lt.s32.totalorder %s354_s13, %s354_s13 }
  0x2d   :  { %p486_p2 = scmp.ne.s32.totalorder %s354_s13, %s485_s14  ;;  %p491_p4 = scmp.lt.s32.totalorder %s485_s14, %s485_s14 }
  0x2f   :  { %391 = vmatpush3.bf16.msra.mxu0 %v432_v2  ;;  %p492_p5 = por %p491_p4, %p490_p3 }
  0x30   :  { %402 = vmatprep.subr.bf16.mxu0 %v543_v0 }
  0x31   :  { %p493_p6 = pnand %p492_p5, %p486_p2 }
  0x32   :  { %393 = vmatmul.mubr.msk.bf16.vlgmr.msra.gmra.mrb[0].mxu0 %vm63_vm1, %v46_v5 }
  0x33   :  { %404 = vmatprep.mubr.msk.bf16.mxu0 %vm544_vm0, %v543_v0 }
 0x105   :  { %v101_v6 = vpop.f32.mrb[0].mxu0 }
 0x106   :  { %v108_v7 = vpack.c.bf16 %v101_v6, %v101_v6  ;;  %v394_v8 = vpop.f32.mrb[1].mxu0 }
 0x107   :  { %v104_v9 = vpop.f32.mrb[2].mxu0 }
 0x108   :  { %111 = vrot.lane.b32.xlu0 %v108_v7, %s545_s1  ;;  %v395_v10 = vpop.f32.mrb[3].mxu0  ;;  %v109_v11 = vpack.c.bf16 %v104_v9, %v104_v9 }
 0x10c   :  { %160 = vrot.lane.b32.xlu0 %v109_v11, %s545_s1 }
 0x17a   :  { %v112_v12 = vpop.permute.xlu0 %111 }
 0x17b   :  { %v117_v13 = vsel %vm63_vm1, %v112_v12, 0 }
 0x17c   :  { %397 = vmatpush3.bf16.xpose.msra.mxu1 %v117_v13 }
 0x17d   :  { %408 = vmatprep.subr.bf16.mxu1 %v543_v0 }
 0x17e   :  { %v161_v14 = vpop.permute.xlu0 %160 }
 0x17f   :  { %v166_v15 = vsel %vm63_vm1, %v161_v14, 0 }
 0x180   :  { %403 = vmatpush3.bf16.xpose.msra.mxu0 %v166_v15 }
 0x181   :  { %414 = vmatprep.subr.bf16.mxu0 %v543_v0 }
 0x183   :  { %399 = vmatmul.mubr.msk.bf16.vlgmr.msra.gmra.mrb[0].mxu1 %vm63_vm1, %v108_v7 }
 0x184   :  { %410 = vmatprep.mubr.msk.bf16.mxu1 %vm544_vm0, %v543_v0 }
 0x187   :  { %405 = vmatmul.mubr.msk.bf16.vlgmr.msra.gmra.mrb[4].mxu0 %vm63_vm1, %v109_v11 }
 0x188   :  { %416 = vmatprep.mubr.msk.bf16.mxu0 %vm544_vm0, %v543_v0 }
 0x256   :  { %v153_v16 = vpop.f32.mrb[0].mxu1 }
 0x257   :  { %v208_v17 = vmul.f32 0.17677669, %v153_v16  ;;  %v400_v18 = vpop.f32.mrb[1].mxu1 }
 0x258   :  { %v156_v19 = vpop.f32.mrb[2].mxu1 }
 0x259   :  { %v401_v20 = vpop.f32.mrb[3].mxu1  ;;  %v211_v21 = vsel %vm210_vm2, %v208_v17, -inf }
 0x25a   :  { %212 = vmax.xlane.f32.xlu1 %v211_v21  ;;  %v202_v22 = vpop.f32.mrb[4].mxu0 }
 0x25b   :  { %v209_v23 = vmul.f32 0.17677669, %v202_v22  ;;  %v406_v24 = vpop.f32.mrb[5].mxu0 }
 0x25c   :  { %v205_v25 = vpop.f32.mrb[6].mxu0 }
 0x25d   :  { %v407_v26 = vpop.f32.mrb[7].mxu0  ;;  %v214_v27 = vsel %vm210_vm2, %v209_v23, -inf }
 0x25e   :  { %215 = vmax.xlane.f32.xlu1 %v214_v27 }
 0x26f   :  { %237 = vrot.lane.b32.xlu1 %v108_v7, %s541_s0 }
 0x2e7   :  { %v213_v28 = vpop.xlane.xlu1 %212 }
 0x2e8   :  { %v217_v29 = vsub.f32 %v208_v17, %v213_v28 }
 0x2ea   :  { %v219_v30 = vmul.f32 1.442695, %v217_v29 }
 0x2eb   :  { %v216_v31 = vpop.xlane.xlu1 %215 }
 0x2ec   :  { %433 = vpow2.f32 %v219_v30  ;;  %v218_v32 = vsub.f32 %v209_v23, %v216_v31 }
 0x2ee   :  { %v221_v33 = vmul.f32 1.442695, %v218_v32 }
 0x2ef   :  { %v238_v34 = vpop.permute.xlu1 %237 }
 0x2f0   :  { %435 = vpow2.f32 %v221_v33  ;;  %v244_v35 = vsel %vm242_vm3, %v238_v34, 0 }
 0x2f1   :  { %409 = vmatpush3.bf16.msra.mxu1 %v244_v35 }
 0x2f6   :  { %v434_v36 = vpop.eup %433 }
 0x2f7   :  { %v223_v37 = vsel %vm210_vm2, %v434_v36, 0.0 }
 0x2f8   :  { %224 = vadd.xlane.f32.xlu0 %v223_v37 }
 0x2fa   :  { %v436_v38 = vpop.eup %435 }
 0x2fb   :  { %v226_v39 = vsel %vm210_vm2, %v436_v38, 0.0 }
 0x2fc   :  { %227 = vadd.xlane.f32.xlu1 %v226_v39 }
 0x30d   :  { %286 = vrot.lane.b32.xlu1 %v109_v11, %s541_s0 }
 0x385   :  { %v225_v40 = vpop.xlane.xlu0 %224 }
 0x386   :  { %437 = vrcp.f32 %v225_v40 }
 0x389   :  { %v228_v41 = vpop.xlane.xlu1 %227 }
 0x38a   :  { %439 = vrcp.f32 %v228_v41 }
 0x38d   :  { %v287_v42 = vpop.permute.xlu1 %286 }
 0x38e   :  { %v292_v43 = vsel %vm242_vm3, %v287_v42, 0 }
 0x38f   :  { %415 = vmatpush3.bf16.msra.mxu0 %v292_v43 }
 0x390   :  { %v438_v44 = vpop.eup %437 }
 0x391   :  { %v231_v45 = vmul.f32 %v438_v44, %v434_v36 }
 0x393   :  { %233 = vst.msk [vmem:[#allocation8] sm:$0xff] %vm210_vm2, %v231_v45  ;;  %v235_v46 = vpack.c.bf16 %v231_v45, %v231_v45 }
 0x394   :  { %v440_v47 = vpop.eup %439 }
 0x395   :  { %v232_v48 = vmul.f32 %v440_v47, %v436_v38  ;;  %411 = vmatmul.mubr.msk.bf16.vlgmr.msra.gmra.mrb[4].mxu1 %vm210_vm2, %v235_v46 }
 0x397   :  { %234 = vst.msk [vmem:[#allocation8 + $0x8] sm:$0xff] %vm210_vm2, %v232_v48  ;;  %v236_v49 = vpack.c.bf16 %v232_v48, %v232_v48 }
 0x399   :  { %417 = vmatmul.mubr.msk.bf16.vlgmr.msra.gmra.mrb[8].mxu0 %vm210_vm2, %v236_v49 }
 0x39a   :  { %496 = shalt.err (!%p493_p6)
}
 0x39b   :  { %s497_s17 = scalar_lea.hbm %s654_s3, 256 }
 0x39c   :  { %p498_p7 = scmp.ne.s32.totalorder %s654_s3, %s497_s17  ;;  %p501_p8 = scmp.lt.u32.totalorder %s497_s17, %s654_s3 }
 0x39e   :  { %p503_p9 = pnand %p501_p8, %p498_p7 }
 0x3a0   :  { %506 = shalt.err (!%p503_p9)
}
 0x3a1   :  { %359 = dma.vmem_to_hbm [thread:$0]  %s354_s13, 256, %s654_s3, [#allocation9], %s538_s22, %s538_s22, %s539_s23  }
 0x3a2   :  { %s547_s26 = smov [#allocation7]  }
 0x3a3   :  { %s341_s27 = sshll.u32 %s547_s26, 4  ;;  %s342_s27 = int_to_ptr.vmem [resolvable:$true] %s341_s27 }
 0x3a4   :  { %s507_s28 = scalar_lea.vmem %s342_s27, 256  ;;  %p512_p11 = scmp.lt.s32.totalorder %s342_s27, %s342_s27 }
 0x3a5   :  { %p508_p10 = scmp.ne.s32.totalorder %s342_s27, %s507_s28  ;;  %p513_p12 = scmp.lt.s32.totalorder %s507_s28, %s507_s28 }
 0x3a7   :  { %p514_p13 = por %p513_p12, %p512_p11 }
 0x3a9   :  { %p515_p0 = pnand %p514_p13, %p508_p10 }
 0x468   :  { %v280_v50 = vpop.f32.mrb[4].mxu1 }
 0x469   :  { %334 = vst.msk [vmem:[#allocation7] sm:$0xff] %vm63_vm1, %v280_v50  ;;  %v412_v51 = vpop.f32.mrb[5].mxu1 }
 0x46a   :  { %v283_v52 = vpop.f32.mrb[6].mxu1 }
 0x46b   :  { %v413_v53 = vpop.f32.mrb[7].mxu1 }
 0x46c   :  { %v328_v54 = vpop.f32.mrb[8].mxu0 }
 0x46d   :  { %335 = vst.msk [vmem:[#allocation7 + $0x8] sm:$0xff] %vm63_vm1, %v328_v54  ;;  %v418_v55 = vpop.f32.mrb[9].mxu0 }
 0x46e   :  { %v331_v56 = vpop.f32.mrb[10].mxu0 }
 0x46f   :  { %518 = shalt.err (!%p515_p0)
}
 0x470   :  { %s519_s30 = scalar_lea.hbm %s653_s2, 256 }
 0x471   :  { %p520_p1 = scmp.ne.s32.totalorder %s653_s2, %s519_s30  ;;  %p523_p2 = scmp.lt.u32.totalorder %s519_s30, %s653_s2 }
 0x473   :  { %p525_p3 = pnand %p523_p2, %p520_p1 }
 0x475   :  { %528 = shalt.err (!%p525_p3)
}
 0x476   :  { %347 = dma.vmem_to_hbm [thread:$0]  %s342_s27, 256, %s653_s2, [#allocation4], %s538_s22, %s538_s22, %s539_s23   ;;  %v419_v57 = vpop.f32.mrb[11].mxu0 }
 0x477   :  { %533 = dma.done.wait [#allocation4], 256  }
 0x478   :  { %534 = vsyncadd [#allocation4], 4294967040 }
 0x479   :  { %535 = dma.done.wait [#allocation9], 256  }
 0x47a   :  { %536 = vsyncadd [#allocation9], 4294967040 }
 0x47b   :  { %366 = vsyncpa [#allocation3], 1 }
 0x47c   :  { %367 = vsyncpa [#allocation6], 1 }
 0x47d   :  { %368 = vsyncpa [#allocation4], 1 }
 0x47e   :  { %369 = vsyncpa [#allocation9], 1 }

</bundles_post_ra>
